<compile_context>
chip_gen: v7x
topology: tpu7x:2x2x1
jax: 0.10.0
libtpu: 0.0.40
codegen_flags: <defaults>
</compile_context>

<pallas_src>
import jax
import jax.numpy as jnp
from jax.experimental import pallas as pl
from jax.experimental.pallas import tpu as pltpu

# ---------------------------------------------------------------------------
# Model hyperparameters (synthetic, deterministic — no checkpoint loading).
# ---------------------------------------------------------------------------
BATCH       = 2
C, H, W     = 1, 8, 8
INPUT_SIZE  = C * H * W      # 64, flattened image
ENC_HIDDEN  = 32             # encoder hidden size
LATENT_DIM  = 16             # encoder.latent_dim
HIDDEN_SIZE = 32             # hparams['hidden_size']
NUM_CLASSES = 10

LANE          = 128           # vreg lane width
SUBLANE_B     = 16            # bf16 sublane packing granularity for batch tiles
COMPUTE_DTYPE = jnp.bfloat16  # MXU inputs; accumulation stays f32

N_LAYERS   = 5
RELU_FLAGS = (True, False, True, True, False)   # enc1, enc2, head1, head2, head3
FEAT_PAD   = LANE   # every feature dim (64/32/16/32/10) zero-pads to 128 lanes


def _round_up(x, m):
    return (x + m - 1) // m * m


# ---------------------------------------------------------------------------
# Pallas kernel: fused 5-layer MLP on one (TILE_B, 128) batch tile.
# Weights/biases are stacked, VMEM-resident slabs (same block every step).
# ---------------------------------------------------------------------------
def classifier_kernel(x_ref, w_ref, b_ref, out_ref):
    h = x_ref[...]                                  # bf16 (TILE_B, 128)
    for layer in range(N_LAYERS):                   # static unroll
        acc = jnp.dot(h, w_ref[layer],              # MXU, f32 accumulate
                      preferred_element_type=jnp.float32)
        acc = acc + b_ref[layer]                    # (1,128) f32 bias on VPU
        if RELU_FLAGS[layer]:
            acc = jnp.maximum(acc, 0.0)
        # cast back to bf16 for the next MXU matmul; final layer stays f32
        h = acc.astype(COMPUTE_DTYPE) if layer + 1 < N_LAYERS else acc
    out_ref[...] = h.astype(out_ref.dtype)          # lane-dense 128-wide store


# ---------------------------------------------------------------------------
# One-time parameter preparation (outside the per-call path):
#   transpose (out,in) -> (in,out), zero-pad features to 128 lanes,
#   cast weights to bf16, keep biases f32, stack all layers into two slabs.
# ---------------------------------------------------------------------------
def prepare_params(params):
    layer_defs = [
        ("enc_w1", "enc_b1"),   # encoder Linear 1
        ("enc_w2", "enc_b2"),   # encoder Linear 2
        ("w1", "b1"),           # head Linear 1
        ("w2", "b2"),           # head Linear 2
        ("w3", "b3"),           # head Linear 3 (logits)
    ]
    w_stack, b_stack = [], []
    for wk, bk in layer_defs:
        w = jnp.asarray(params[wk], jnp.float32).T          # (in, out)
        assert w.shape[0] <= FEAT_PAD and w.shape[1] <= FEAT_PAD
        w = jnp.pad(w, ((0, FEAT_PAD - w.shape[0]),
                        (0, FEAT_PAD - w.shape[1])))
        w_stack.append(w.astype(COMPUTE_DTYPE))

        b = jnp.asarray(params[bk], jnp.float32).reshape(1, -1)
        b = jnp.pad(b, ((0, 0), (0, FEAT_PAD - b.shape[1])))
        b_stack.append(b)

    # (5, 128, 128) bf16  and  (5, 1, 128) f32
    return jnp.stack(w_stack, axis=0), jnp.stack(b_stack, axis=0)


# ---------------------------------------------------------------------------
# Forward wrapper: grid over the batch, slice padded logits back to 10.
# ---------------------------------------------------------------------------
def classifier_forward(x_flat, w_stack, b_stack, *, tile_b=256):
    """x_flat: [B, INPUT_SIZE] float32. w_stack/b_stack from prepare_params."""
    B = x_flat.shape[0]
    # Modest tile keeps double-buffered x/out tiles trivially under the v5e
    # default 16 MiB scoped VMEM (256-row bf16 x tile is only 64 KiB).
    tile_b = min(tile_b, _round_up(B, SUBLANE_B))
    b_pad = _round_up(B, tile_b)

    x = jnp.asarray(x_flat, jnp.float32)
    x = jnp.pad(x, ((0, b_pad - B), (0, FEAT_PAD - x.shape[1]))).astype(COMPUTE_DTYPE)

    grid = (b_pad // tile_b,)

    out = pl.pallas_call(
        classifier_kernel,
        out_shape=jax.ShapeDtypeStruct((b_pad, FEAT_PAD), jnp.float32),
        grid=grid,
        in_specs=[
            pl.BlockSpec((tile_b, FEAT_PAD), lambda i: (i, 0)),               # x tile
            pl.BlockSpec((N_LAYERS, FEAT_PAD, FEAT_PAD), lambda i: (0, 0, 0)),  # resident W
            pl.BlockSpec((N_LAYERS, 1, FEAT_PAD), lambda i: (0, 0, 0)),         # resident b
        ],
        out_specs=pl.BlockSpec((tile_b, FEAT_PAD), lambda i: (i, 0)),
        compiler_params=pltpu.CompilerParams(
            dimension_semantics=("parallel",),   # shard batch across TCs on v7x
        ),
    )(x, w_stack, b_stack)

    return out[:B, :NUM_CLASSES]


# ---------------------------------------------------------------------------
# Deterministic parameter init (synthetic, PyTorch nn.Linear layout).
# ---------------------------------------------------------------------------
def init_params(key):
    keys = jax.random.split(key, 10)

    def lin(kw, kb, out_f, in_f):
        w = jax.random.normal(kw, (out_f, in_f), jnp.float32) * 0.1
        b = jax.random.normal(kb, (out_f,), jnp.float32) * 0.1
        return w, b

    enc_w1, enc_b1 = lin(keys[0], keys[1], ENC_HIDDEN, INPUT_SIZE)
    enc_w2, enc_b2 = lin(keys[2], keys[3], LATENT_DIM, ENC_HIDDEN)
    w1, b1 = lin(keys[4], keys[5], HIDDEN_SIZE, LATENT_DIM)
    w2, b2 = lin(keys[6], keys[7], HIDDEN_SIZE, HIDDEN_SIZE)
    w3, b3 = lin(keys[8], keys[9], NUM_CLASSES, HIDDEN_SIZE)
    return dict(enc_w1=enc_w1, enc_b1=enc_b1, enc_w2=enc_w2, enc_b2=enc_b2,
                w1=w1, b1=b1, w2=w2, b2=b2, w3=w3, b3=b3)


# Pure-JAX references for correctness checks.
def reference_forward_f32(x_flat, p):
    def lin(h, w, b):
        return h @ w.T + b
    h = jax.nn.relu(lin(x_flat, p["enc_w1"], p["enc_b1"]))
    z = lin(h, p["enc_w2"], p["enc_b2"])
    h1 = jax.nn.relu(lin(z, p["w1"], p["b1"]))
    h2 = jax.nn.relu(lin(h1, p["w2"], p["b2"]))
    return lin(h2, p["w3"], p["b3"])


def reference_forward_bf16(x_flat, p):
    """Mimics the kernel's bf16 inputs + f32 accumulation."""
    def lin(h, w, b):
        return jnp.dot(h.astype(COMPUTE_DTYPE),
                       jnp.asarray(w, jnp.float32).T.astype(COMPUTE_DTYPE),
                       preferred_element_type=jnp.float32) + jnp.asarray(b, jnp.float32)
    h = jax.nn.relu(lin(x_flat, p["enc_w1"], p["enc_b1"]))
    z = lin(h, p["enc_w2"], p["enc_b2"])
    h1 = jax.nn.relu(lin(z, p["w1"], p["b1"]))
    h2 = jax.nn.relu(lin(h1, p["w2"], p["b2"]))
    return lin(h2, p["w3"], p["b3"])


if __name__ == "__main__":
    key = jax.random.PRNGKey(0)
    k_img, k_params = jax.random.split(key)

    # NCHW image input, flattened exactly like getAcc: X.view(X.shape[0], -1)
    x_img = jax.random.normal(k_img, (BATCH, C, H, W), jnp.float32)
    x_flat = x_img.reshape(BATCH, -1)

    params = init_params(k_params)
    w_stack, b_stack = prepare_params(params)   # one-time transpose+pad+bf16+stack

    fwd = jax.jit(classifier_forward)
    logits = fwd(x_flat, w_stack, b_stack)
    logits = jax.block_until_ready(logits)

    ref_bf16 = reference_forward_bf16(x_flat, params)
    ref_f32 = reference_forward_f32(x_flat, params)

    assert logits.shape == (BATCH, NUM_CLASSES)
    assert jnp.allclose(logits, ref_bf16, atol=1e-3, rtol=1e-3), \
        "mismatch vs bf16-mimicking reference"
    assert jnp.allclose(logits, ref_f32, atol=3e-2, rtol=3e-2), \
        "mismatch vs f32 reference"

    # TODO(synk): optimizer setup (Adam) and the getAcc dataloader eval loop are
    # training/eval utilities with no kernel equivalent; only forward() is implemented.
    print("KERNEL_OK")
</pallas_src>

<mosaic_0001>
module attributes {stable_mosaic.version = 11 : i64} {
  func.func @classifier_kernel(%arg0: i32, %arg1: memref<16x128xbf16, #tpu.memory_space<vmem>>, %arg2: memref<5x128x128xbf16, #tpu.memory_space<vmem>>, %arg3: memref<5x1x128xf32, #tpu.memory_space<vmem>>, %arg4: memref<16x128xf32, #tpu.memory_space<vmem>>) attributes {dimension_semantics = [#tpu.dimension_semantics<parallel>], iteration_bounds = array<i64: 1>, scalar_prefetch = 0 : i64, scratch_operands = 0 : i64, tpu.core_type = #tpu.core_type<tc>, window_params = [{transform_indices = @transform_0, window_bounds = array<i64: 16, 128>}, {pipeline_mode = #tpu.pipeline_mode<synchronous>, transform_indices = @transform_1, window_bounds = array<i64: 5, 128, 128>}, {pipeline_mode = #tpu.pipeline_mode<synchronous>, transform_indices = @transform_2, window_bounds = array<i64: 5, 1, 128>}, {transform_indices = @transform_3, window_bounds = array<i64: 16, 128>}]} {
    %c0 = arith.constant 0 : index
    %c0_0 = arith.constant 0 : index
    %0 = vector.load %arg1[%c0, %c0_0] : memref<16x128xbf16, #tpu.memory_space<vmem>>, vector<16x128xbf16>
    %c0_1 = arith.constant 0 : index
    %c0_2 = arith.constant 0 : index
    %c0_3 = arith.constant 0 : index
    %1 = vector.load %arg2[%c0_1, %c0_2, %c0_3] : memref<5x128x128xbf16, #tpu.memory_space<vmem>>, vector<1x128x128xbf16>
    %2 = vector.shape_cast %1 : vector<1x128x128xbf16> to vector<128x128xbf16>
    %cst = arith.constant dense<0.000000e+00> : vector<16x128xf32>
    %3 = tpu.matmul %0, %2, %cst {dimension_numbers = #tpu.dot_dimension_numbers<[1], [0], [0], [1], [0, 0, 1, 1], [], []>} : vector<16x128xbf16>, vector<128x128xbf16>, vector<16x128xf32> -> vector<16x128xf32>
    %c0_4 = arith.constant 0 : index
    %c0_5 = arith.constant 0 : index
    %c0_6 = arith.constant 0 : index
    %4 = vector.load %arg3[%c0_4, %c0_5, %c0_6] : memref<5x1x128xf32, #tpu.memory_space<vmem>>, vector<1x1x128xf32>
    %5 = vector.shape_cast %4 : vector<1x1x128xf32> to vector<1x128xf32>
    %6 = vector.broadcast %5 : vector<1x128xf32> to vector<16x128xf32>
    %7 = arith.addf %3, %6 : vector<16x128xf32>
    %cst_7 = arith.constant 0.000000e+00 : f32
    %8 = vector.broadcast %cst_7 : f32 to vector<16x128xf32>
    %9 = arith.maximumf %7, %8 : vector<16x128xf32>
    %10 = arith.truncf %9 : vector<16x128xf32> to vector<16x128xbf16>
    %c1 = arith.constant 1 : index
    %c0_8 = arith.constant 0 : index
    %c0_9 = arith.constant 0 : index
    %11 = vector.load %arg2[%c1, %c0_8, %c0_9] : memref<5x128x128xbf16, #tpu.memory_space<vmem>>, vector<1x128x128xbf16>
    %12 = vector.shape_cast %11 : vector<1x128x128xbf16> to vector<128x128xbf16>
    %cst_10 = arith.constant dense<0.000000e+00> : vector<16x128xf32>
    %13 = tpu.matmul %10, %12, %cst_10 {dimension_numbers = #tpu.dot_dimension_numbers<[1], [0], [0], [1], [0, 0, 1, 1], [], []>} : vector<16x128xbf16>, vector<128x128xbf16>, vector<16x128xf32> -> vector<16x128xf32>
    %c1_11 = arith.constant 1 : index
    %c0_12 = arith.constant 0 : index
    %c0_13 = arith.constant 0 : index
    %14 = vector.load %arg3[%c1_11, %c0_12, %c0_13] : memref<5x1x128xf32, #tpu.memory_space<vmem>>, vector<1x1x128xf32>
    %15 = vector.shape_cast %14 : vector<1x1x128xf32> to vector<1x128xf32>
    %16 = vector.broadcast %15 : vector<1x128xf32> to vector<16x128xf32>
    %17 = arith.addf %13, %16 : vector<16x128xf32>
    %18 = arith.truncf %17 : vector<16x128xf32> to vector<16x128xbf16>
    %c2 = arith.constant 2 : index
    %c0_14 = arith.constant 0 : index
    %c0_15 = arith.constant 0 : index
    %19 = vector.load %arg2[%c2, %c0_14, %c0_15] : memref<5x128x128xbf16, #tpu.memory_space<vmem>>, vector<1x128x128xbf16>
    %20 = vector.shape_cast %19 : vector<1x128x128xbf16> to vector<128x128xbf16>
    %cst_16 = arith.constant dense<0.000000e+00> : vector<16x128xf32>
    %21 = tpu.matmul %18, %20, %cst_16 {dimension_numbers = #tpu.dot_dimension_numbers<[1], [0], [0], [1], [0, 0, 1, 1], [], []>} : vector<16x128xbf16>, vector<128x128xbf16>, vector<16x128xf32> -> vector<16x128xf32>
    %c2_17 = arith.constant 2 : index
    %c0_18 = arith.constant 0 : index
    %c0_19 = arith.constant 0 : index
    %22 = vector.load %arg3[%c2_17, %c0_18, %c0_19] : memref<5x1x128xf32, #tpu.memory_space<vmem>>, vector<1x1x128xf32>
    %23 = vector.shape_cast %22 : vector<1x1x128xf32> to vector<1x128xf32>
    %24 = vector.broadcast %23 : vector<1x128xf32> to vector<16x128xf32>
    %25 = arith.addf %21, %24 : vector<16x128xf32>
    %cst_20 = arith.constant 0.000000e+00 : f32
    %26 = vector.broadcast %cst_20 : f32 to vector<16x128xf32>
    %27 = arith.maximumf %25, %26 : vector<16x128xf32>
    %28 = arith.truncf %27 : vector<16x128xf32> to vector<16x128xbf16>
    %c3 = arith.constant 3 : index
    %c0_21 = arith.constant 0 : index
    %c0_22 = arith.constant 0 : index
    %29 = vector.load %arg2[%c3, %c0_21, %c0_22] : memref<5x128x128xbf16, #tpu.memory_space<vmem>>, vector<1x128x128xbf16>
    %30 = vector.shape_cast %29 : vector<1x128x128xbf16> to vector<128x128xbf16>
    %cst_23 = arith.constant dense<0.000000e+00> : vector<16x128xf32>
    %31 = tpu.matmul %28, %30, %cst_23 {dimension_numbers = #tpu.dot_dimension_numbers<[1], [0], [0], [1], [0, 0, 1, 1], [], []>} : vector<16x128xbf16>, vector<128x128xbf16>, vector<16x128xf32> -> vector<16x128xf32>
    %c3_24 = arith.constant 3 : index
    %c0_25 = arith.constant 0 : index
    %c0_26 = arith.constant 0 : index
    %32 = vector.load %arg3[%c3_24, %c0_25, %c0_26] : memref<5x1x128xf32, #tpu.memory_space<vmem>>, vector<1x1x128xf32>
    %33 = vector.shape_cast %32 : vector<1x1x128xf32> to vector<1x128xf32>
    %34 = vector.broadcast %33 : vector<1x128xf32> to vector<16x128xf32>
    %35 = arith.addf %31, %34 : vector<16x128xf32>
    %cst_27 = arith.constant 0.000000e+00 : f32
    %36 = vector.broadcast %cst_27 : f32 to vector<16x128xf32>
    %37 = arith.maximumf %35, %36 : vector<16x128xf32>
    %38 = arith.truncf %37 : vector<16x128xf32> to vector<16x128xbf16>
    %c4 = arith.constant 4 : index
    %c0_28 = arith.constant 0 : index
    %c0_29 = arith.constant 0 : index
    %39 = vector.load %arg2[%c4, %c0_28, %c0_29] : memref<5x128x128xbf16, #tpu.memory_space<vmem>>, vector<1x128x128xbf16>
    %40 = vector.shape_cast %39 : vector<1x128x128xbf16> to vector<128x128xbf16>
    %cst_30 = arith.constant dense<0.000000e+00> : vector<16x128xf32>
    %41 = tpu.matmul %38, %40, %cst_30 {dimension_numbers = #tpu.dot_dimension_numbers<[1], [0], [0], [1], [0, 0, 1, 1], [], []>} : vector<16x128xbf16>, vector<128x128xbf16>, vector<16x128xf32> -> vector<16x128xf32>
    %c4_31 = arith.constant 4 : index
    %c0_32 = arith.constant 0 : index
    %c0_33 = arith.constant 0 : index
    %42 = vector.load %arg3[%c4_31, %c0_32, %c0_33] : memref<5x1x128xf32, #tpu.memory_space<vmem>>, vector<1x1x128xf32>
    %43 = vector.shape_cast %42 : vector<1x1x128xf32> to vector<1x128xf32>
    %44 = vector.broadcast %43 : vector<1x128xf32> to vector<16x128xf32>
    %45 = arith.addf %41, %44 : vector<16x128xf32>
    %c0_34 = arith.constant 0 : index
    %c0_35 = arith.constant 0 : index
    %46 = vector.load %arg4[%c0_34, %c0_35] : memref<16x128xf32, #tpu.memory_space<vmem>>, vector<16x128xf32>
    tpu.vector_store %arg4[%c0_34, %c0_35], %45 {strides = array<i32>} : memref<16x128xf32, #tpu.memory_space<vmem>>, vector<16x128xf32>,
    return
  }
  func.func @transform_0(%arg0: i32) -> (i32, i32) {
    %c0_i32 = arith.constant 0 : i32
    %c0_i32_0 = arith.constant 0 : i32
    return %arg0, %c0_i32 : i32, i32
  }
  func.func @transform_1(%arg0: i32) -> (i32, i32, i32) {
    %c0_i32 = arith.constant 0 : i32
    %c0_i32_0 = arith.constant 0 : i32
    %c0_i32_1 = arith.constant 0 : i32
    %c0_i32_2 = arith.constant 0 : i32
    return %c0_i32, %c0_i32_0, %c0_i32_1 : i32, i32, i32
  }
  func.func @transform_2(%arg0: i32) -> (i32, i32, i32) {
    %c0_i32 = arith.constant 0 : i32
    %c0_i32_0 = arith.constant 0 : i32
    %c0_i32_1 = arith.constant 0 : i32
    %c0_i32_2 = arith.constant 0 : i32
    return %c0_i32, %c0_i32_0, %c0_i32_1 : i32, i32, i32
  }
  func.func @transform_3(%arg0: i32) -> (i32, i32) {
    %c0_i32 = arith.constant 0 : i32
    %c0_i32_0 = arith.constant 0 : i32
    return %arg0, %c0_i32 : i32, i32
  }
}

</mosaic_0001>

<bundles_post_ra>
// kernel: classifier_forward.1
= control target key start
LH: loop header
LB: loop body
LE: loop exit
PB: predicated region body
PF: predicated region fallthrough
CT: control target
= control target key end

     0   :  { %8 = vsyncpa [#allocation3], 0  ;;  %s887_s12 = smov [#allocation2]   ;;  %s998_s0 = inlined_call_operand.vmem [shape: bf16[16,128], index: 0, kind: input, shape index: {}]   ;;  %s999_s1 = inlined_call_operand.hbm [shape: bf16[5,128,128], index: 1, kind: input, shape index: {}]   ;;  %s1000_s2 = inlined_call_operand.vmem [shape: f32[5,1,128], index: 2, kind: input, shape index: {}]   ;;  %s1001_s3 = inlined_call_operand.vmem [shape: f32[16,128], index: 3, kind: output, shape index: {}]  }
   0x1   :  { %s16_s13 = sshll.u32 %s887_s12, 4  ;;  %s863_s16 = scalar_lea.hbm %s999_s1, 5120  ;;  %s17_s13 = int_to_ptr.vmem [resolvable:$true] %s16_s13 }
   0x2   :  { %p864_p0 = scmp.ne.s32.totalorder %s999_s1, %s863_s16  ;;  %p867_p1 = scmp.lt.u32.totalorder %s863_s16, %s999_s1 }
   0x4   :  { %p869_p2 = pnand %p867_p1, %p864_p0 }
   0x6   :  { %872 = shalt.err (!%p869_p2)
}
   0x7   :  { %s873_s21 = scalar_lea.vmem %s17_s13, 5120  ;;  %p878_p4 = scmp.lt.s32.totalorder %s17_s13, %s17_s13 }
   0x8   :  { %p874_p3 = scmp.ne.s32.totalorder %s17_s13, %s873_s21  ;;  %p879_p5 = scmp.lt.s32.totalorder %s873_s21, %s873_s21 }
   0xa   :  { %p880_p6 = por %p879_p5, %p878_p4 }
   0xc   :  { %p881_p7 = pnand %p880_p6, %p874_p3 }
   0xe   :  { %884 = shalt.err (!%p881_p7)
}
   0xf   :  { %s888_s22 = smov 64   ;;  %s889_s23 = smov 4  }
  0x10   :  { %22 = dma.hbm_to_vmem [thread:$0]  %s999_s1, 5120, %s17_s13, [#allocation3], %s888_s22, %s888_s22, %s889_s23  }
  0x11   :  { %885 = dma.done.wait [#allocation3], 5120  }
  0x12   :  { %886 = vsyncadd [#allocation3], 4294962176  ;;  %v890_v0 = vmov 0.0   ;;  %vm891_vm0 = vmmov 0   ;;  %v822_v1 = vld [vmem:[#allocation2] sm:$0xff]   ;;  %v823_v2 = vld [vmem:[#allocation2 + $0x8] sm:$0xff]  }
  0x13   :  { %717 = vmatprep.subr.bf16.mxu0 %v890_v0  ;;  %733 = vmatprep.mubr.msk.bf16.mxu0 %vm891_vm0, %v890_v0  ;;  %v824_v3 = vld [vmem:[#allocation2 + $0x10] sm:$0xff]   ;;  %v831_v4 = vld [vmem:[#allocation2 + $0x40] sm:$0xff]   ;;  %v825_v5 = vld [vmem:[#allocation2 + $0x18] sm:$0xff]  }
  0x14   :  { %737 = vmatprep.subr.bf16.mxu1 %v890_v0  ;;  %753 = vmatprep.mubr.msk.bf16.mxu1 %vm891_vm0, %v890_v0  ;;  %v832_v6 = vld [vmem:[#allocation2 + $0x48] sm:$0xff]   ;;  %v826_v7 = vld [vmem:[#allocation2 + $0x20] sm:$0xff]   ;;  %v833_v8 = vld [vmem:[#allocation2 + $0x50] sm:$0xff]  }
  0x15   :  { %718 = vmatpush3.bf16.msra.mxu0 %v822_v1  ;;  %738 = vmatpush3.bf16.msra.mxu1 %v831_v4  ;;  %v827_v9 = vld [vmem:[#allocation2 + $0x28] sm:$0xff]   ;;  %v834_v10 = vld [vmem:[#allocation2 + $0x58] sm:$0xff]   ;;  %v828_v11 = vld [vmem:[#allocation2 + $0x30] sm:$0xff]  }
  0x16   :  { %719 = vmatprep.subr.bf16.mxu0 %v890_v0  ;;  %739 = vmatprep.subr.bf16.mxu1 %v890_v0  ;;  %v835_v12 = vld [vmem:[#allocation2 + $0x60] sm:$0xff]   ;;  %v829_v13 = vld [vmem:[#allocation2 + $0x38] sm:$0xff]   ;;  %v836_v14 = vld [vmem:[#allocation2 + $0x68] sm:$0xff]  }
  0x17   :  { %v830_v15 = vld [vmem:[%s998_s0] sm:$0xff]   ;;  %v837_v16 = vld [vmem:[#allocation2 + $0x70] sm:$0xff]   ;;  %v838_v17 = vld [vmem:[#allocation2 + $0x78] sm:$0xff]  }
  0x18   :  { %v839_v18 = vld [vmem:[#allocation2 + $0x80] sm:$0xff]   ;;  %v840_v19 = vld [vmem:[#allocation2 + $0x88] sm:$0xff]   ;;  %v841_v20 = vld [vmem:[#allocation2 + $0x90] sm:$0xff]  }
  0x19   :  { %720 = vmatpush3.bf16.msra.mxu0 %v823_v2  ;;  %740 = vmatpush3.bf16.msra.mxu1 %v832_v6  ;;  %v842_v21 = vld [vmem:[#allocation2 + $0x98] sm:$0xff]   ;;  %v843_v22 = vld [vmem:[#allocation2 + $0xa0] sm:$0xff]   ;;  %v844_v23 = vld [vmem:[#allocation2 + $0xa8] sm:$0xff]  }
  0x1a   :  { %721 = vmatprep.subr.bf16.mxu0 %v890_v0  ;;  %741 = vmatprep.subr.bf16.mxu1 %v890_v0  ;;  %v622_v24 = vld [vmem:[%s1000_s2] ss:$0 sm:$0xff]  ;;  %v845_v34 = vld [vmem:[#allocation2 + $0xb0] sm:$0xff]   ;;  %v846_v35 = vld [vmem:[#allocation2 + $0xb8] sm:$0xff]  }
  0x1b   :  { %v847_v36 = vld [vmem:[#allocation2 + $0xc0] sm:$0xff]   ;;  %v848_v37 = vld [vmem:[#allocation2 + $0xc8] sm:$0xff]   ;;  %v849_v38 = vld [vmem:[#allocation2 + $0xd0] sm:$0xff]  }
  0x1c   :  { %v850_v39 = vld [vmem:[#allocation2 + $0xd8] sm:$0xff]   ;;  %v851_v40 = vld [vmem:[#allocation2 + $0xe0] sm:$0xff]   ;;  %v852_v41 = vld [vmem:[#allocation2 + $0xe8] sm:$0xff]  }
  0x1d   :  { %722 = vmatpush3.bf16.msra.mxu0 %v824_v3  ;;  %742 = vmatpush3.bf16.msra.mxu1 %v833_v8  ;;  %v633_v42 = vld [vmem:[%s1000_s2 + $0x1] ss:$0 sm:$0xff]  ;;  %v853_v50 = vld [vmem:[#allocation2 + $0xf0] sm:$0xff]   ;;  %v854_v51 = vld [vmem:[#allocation2 + $0xf8] sm:$0xff]  }
  0x1e   :  { %723 = vmatprep.subr.bf16.mxu0 %v890_v0  ;;  %743 = vmatprep.subr.bf16.mxu1 %v890_v0  ;;  %v855_v52 = vld [vmem:[#allocation2 + $0x100] sm:$0xff]   ;;  %v856_v53 = vld [vmem:[#allocation2 + $0x108] sm:$0xff]   ;;  %v857_v54 = vld [vmem:[#allocation2 + $0x110] sm:$0xff]  }
  0x1f   :  { %v858_v55 = vld [vmem:[#allocation2 + $0x118] sm:$0xff]   ;;  %v859_v56 = vld [vmem:[#allocation2 + $0x120] sm:$0xff]   ;;  %v860_v57 = vld [vmem:[#allocation2 + $0x128] sm:$0xff]  }
  0x20   :  { %v643_v58 = vld [vmem:[%s1000_s2 + $0x2] ss:$0 sm:$0xff]  ;;  %v862_v6 = vld [vmem:[#allocation2 + $0x138] sm:$0xff]  }
  0x21   :  { %724 = vmatpush3.bf16.msra.mxu0 %v825_v5  ;;  %744 = vmatpush3.bf16.msra.mxu1 %v834_v10  ;;  %v861_v5 = vld [vmem:[#allocation2 + $0x130] sm:$0xff]  }
  0x22   :  { %725 = vmatprep.subr.bf16.mxu0 %v890_v0  ;;  %745 = vmatprep.subr.bf16.mxu1 %v890_v0 }
  0x25   :  { %726 = vmatpush3.bf16.msra.mxu0 %v826_v7  ;;  %746 = vmatpush3.bf16.msra.mxu1 %v835_v12  ;;  %v653_v7 = vld [vmem:[%s1000_s2 + $0x3] ss:$0 sm:$0xff] }
  0x26   :  { %727 = vmatprep.subr.bf16.mxu0 %v890_v0  ;;  %747 = vmatprep.subr.bf16.mxu1 %v890_v0 }
  0x29   :  { %728 = vmatpush3.bf16.msra.mxu0 %v827_v9  ;;  %748 = vmatpush3.bf16.msra.mxu1 %v836_v14 }
  0x2a   :  { %729 = vmatprep.subr.bf16.mxu0 %v890_v0  ;;  %749 = vmatprep.subr.bf16.mxu1 %v890_v0 }
  0x2d   :  { %730 = vmatpush3.bf16.msra.mxu0 %v828_v11  ;;  %750 = vmatpush3.bf16.msra.mxu1 %v837_v16 }
  0x2e   :  { %731 = vmatprep.subr.bf16.mxu0 %v890_v0  ;;  %751 = vmatprep.subr.bf16.mxu1 %v890_v0 }
  0x31   :  { %732 = vmatpush3.bf16.msra.mxu0 %v829_v13  ;;  %752 = vmatpush3.bf16.msra.mxu1 %v838_v17 }
  0x32   :  { %757 = vmatprep.subr.bf16.mxu0 %v890_v0  ;;  %777 = vmatprep.subr.bf16.mxu1 %v890_v0 }
  0x34   :  { %734 = vmatmul.mubr.bf16.vlgmr.msra.gmra.mrb[0].mxu0 %v830_v15 }
  0x35   :  { %773 = vmatprep.mubr.msk.bf16.mxu0 %vm891_vm0, %v890_v0  ;;  %758 = vmatpush3.bf16.msra.mxu0 %v839_v18 }
  0x36   :  { %759 = vmatprep.subr.bf16.mxu0 %v890_v0 }
  0x39   :  { %760 = vmatpush3.bf16.msra.mxu0 %v840_v19 }
  0x3a   :  { %761 = vmatprep.subr.bf16.mxu0 %v890_v0 }
  0x3d   :  { %762 = vmatpush3.bf16.msra.mxu0 %v841_v20 }
  0x3e   :  { %763 = vmatprep.subr.bf16.mxu0 %v890_v0 }
  0x41   :  { %764 = vmatpush3.bf16.msra.mxu0 %v842_v21 }
  0x42   :  { %765 = vmatprep.subr.bf16.mxu0 %v890_v0 }
  0x45   :  { %766 = vmatpush3.bf16.msra.mxu0 %v843_v22 }
  0x46   :  { %767 = vmatprep.subr.bf16.mxu0 %v890_v0 }
  0x49   :  { %768 = vmatpush3.bf16.msra.mxu0 %v844_v23 }
  0x4a   :  { %769 = vmatprep.subr.bf16.mxu0 %v890_v0 }
  0x4d   :  { %770 = vmatpush3.bf16.msra.mxu0 %v845_v34 }
  0x4e   :  { %771 = vmatprep.subr.bf16.mxu0 %v890_v0 }
  0x51   :  { %772 = vmatpush3.bf16.msra.mxu0 %v846_v35 }
  0x52   :  { %797 = vmatprep.subr.bf16.mxu0 %v890_v0 }
 0x107   :  { %v142_v25 = vpop.f32.mrb[0].mxu0 }
 0x108   :  { %v143_v26 = vadd.f32 %v622_v24, %v142_v25  ;;  %v735_v27 = vpop.f32.mrb[1].mxu0 }
 0x109   :  { %v145_v28 = vpop.f32.mrb[2].mxu0 }
 0x10a   :  { %v146_v29 = vadd.f32 %v622_v24, %v145_v28  ;;  %v736_v30 = vpop.f32.mrb[3].mxu0  ;;  %v149_v31 = vmax.f32 %v143_v26, 0.0 }
 0x10c   :  { %v150_v32 = vmax.f32 %v146_v29, 0.0 }
 0x10e   :  { %v151_v33 = vpack.c.bf16 %v150_v32, %v149_v31 }
 0x110   :  { %754 = vmatmul.mubr.bf16.vlgmr.msra.gmra.mrb[0].mxu1 %v151_v33 }
 0x111   :  { %793 = vmatprep.mubr.msk.bf16.mxu1 %vm891_vm0, %v890_v0  ;;  %778 = vmatpush3.bf16.msra.mxu1 %v847_v36 }
 0x112   :  { %779 = vmatprep.subr.bf16.mxu1 %v890_v0 }
 0x115   :  { %780 = vmatpush3.bf16.msra.mxu1 %v848_v37 }
 0x116   :  { %781 = vmatprep.subr.bf16.mxu1 %v890_v0 }
 0x119   :  { %782 = vmatpush3.bf16.msra.mxu1 %v849_v38 }
 0x11a   :  { %783 = vmatprep.subr.bf16.mxu1 %v890_v0 }
 0x11d   :  { %784 = vmatpush3.bf16.msra.mxu1 %v850_v39 }
 0x11e   :  { %785 = vmatprep.subr.bf16.mxu1 %v890_v0 }
 0x121   :  { %786 = vmatpush3.bf16.msra.mxu1 %v851_v40 }
 0x122   :  { %787 = vmatprep.subr.bf16.mxu1 %v890_v0 }
 0x125   :  { %788 = vmatpush3.bf16.msra.mxu1 %v852_v41 }
 0x126   :  { %789 = vmatprep.subr.bf16.mxu1 %v890_v0 }
 0x129   :  { %790 = vmatpush3.bf16.msra.mxu1 %v853_v50 }
 0x12a   :  { %791 = vmatprep.subr.bf16.mxu1 %v890_v0 }
 0x12d   :  { %792 = vmatpush3.bf16.msra.mxu1 %v854_v51 }
 0x1e3   :  { %v259_v43 = vpop.f32.mrb[0].mxu1 }
 0x1e4   :  { %v755_v44 = vpop.f32.mrb[1].mxu1  ;;  %v260_v46 = vadd.f32 %v633_v42, %v259_v43 }
 0x1e5   :  { %v262_v45 = vpop.f32.mrb[2].mxu1 }
 0x1e6   :  { %v263_v47 = vadd.f32 %v633_v42, %v262_v45  ;;  %v756_v48 = vpop.f32.mrb[3].mxu1 }
 0x1e8   :  { %v266_v49 = vpack.c.bf16 %v263_v47, %v260_v46 }
 0x1ea   :  { %774 = vmatmul.mubr.bf16.vlgmr.msra.gmra.mrb[4].mxu0 %v266_v49 }
 0x1eb   :  { %813 = vmatprep.mubr.msk.bf16.mxu0 %vm891_vm0, %v890_v0  ;;  %798 = vmatpush3.bf16.msra.mxu0 %v855_v52 }
 0x1ec   :  { %799 = vmatprep.subr.bf16.mxu0 %v890_v0 }
 0x1ef   :  { %800 = vmatpush3.bf16.msra.mxu0 %v856_v53 }
 0x1f0   :  { %801 = vmatprep.subr.bf16.mxu0 %v890_v0 }
 0x1f3   :  { %802 = vmatpush3.bf16.msra.mxu0 %v857_v54 }
 0x1f4   :  { %803 = vmatprep.subr.bf16.mxu0 %v890_v0 }
 0x1f7   :  { %804 = vmatpush3.bf16.msra.mxu0 %v858_v55 }
 0x1f8   :  { %805 = vmatprep.subr.bf16.mxu0 %v890_v0 }
 0x1fb   :  { %806 = vmatpush3.bf16.msra.mxu0 %v859_v56 }
 0x1fc   :  { %807 = vmatprep.subr.bf16.mxu0 %v890_v0 }
 0x1ff   :  { %808 = vmatpush3.bf16.msra.mxu0 %v860_v57 }
 0x200   :  { %809 = vmatprep.subr.bf16.mxu0 %v890_v0 }
 0x203   :  { %810 = vmatpush3.bf16.msra.mxu0 %v861_v5 }
 0x204   :  { %811 = vmatprep.subr.bf16.mxu0 %v890_v0  ;;  %v663_v0 = vld [vmem:[%s1000_s2 + $0x4] ss:$0 sm:$0xff] }
 0x207   :  { %812 = vmatpush3.bf16.msra.mxu0 %v862_v6 }
 0x2bd   :  { %v374_v59 = vpop.f32.mrb[4].mxu0 }
 0x2be   :  { %v375_v60 = vadd.f32 %v643_v58, %v374_v59  ;;  %v775_v61 = vpop.f32.mrb[5].mxu0 }
 0x2bf   :  { %v377_v62 = vpop.f32.mrb[6].mxu0 }
 0x2c0   :  { %v378_v63 = vadd.f32 %v643_v58, %v377_v62  ;;  %v776_v1 = vpop.f32.mrb[7].mxu0  ;;  %v381_v2 = vmax.f32 %v375_v60, 0.0 }
 0x2c2   :  { %v382_v3 = vmax.f32 %v378_v63, 0.0 }
 0x2c4   :  { %v383_v4 = vpack.c.bf16 %v382_v3, %v381_v2 }
 0x2c6   :  { %794 = vmatmul.mubr.bf16.vlgmr.msra.gmra.mrb[4].mxu1 %v383_v4 }
 0x399   :  { %v491_v8 = vpop.f32.mrb[4].mxu1 }
 0x39a   :  { %v492_v9 = vadd.f32 %v653_v7, %v491_v8  ;;  %v795_v10 = vpop.f32.mrb[5].mxu1 }
 0x39b   :  { %v494_v11 = vpop.f32.mrb[6].mxu1 }
 0x39c   :  { %v495_v12 = vadd.f32 %v653_v7, %v494_v11  ;;  %v796_v13 = vpop.f32.mrb[7].mxu1  ;;  %v498_v14 = vmax.f32 %v492_v9, 0.0 }
 0x39e   :  { %v499_v15 = vmax.f32 %v495_v12, 0.0 }
 0x3a0   :  { %v500_v16 = vpack.c.bf16 %v499_v15, %v498_v14 }
 0x3a2   :  { %814 = vmatmul.mubr.bf16.vlgmr.msra.gmra.mrb[8].mxu0 %v500_v16 }
 0x475   :  { %v608_v17 = vpop.f32.mrb[8].mxu0 }
 0x476   :  { %v609_v18 = vadd.f32 %v663_v0, %v608_v17  ;;  %v815_v19 = vpop.f32.mrb[9].mxu0 }
 0x477   :  { %v611_v20 = vpop.f32.mrb[10].mxu0 }
 0x478   :  { %615 = vst [vmem:[%s1001_s3] sm:$0xff] %v609_v18  ;;  %v612_v21 = vadd.f32 %v663_v0, %v611_v20  ;;  %v816_v22 = vpop.f32.mrb[11].mxu0 }
 0x47a   :  { %616 = vst [vmem:[%s1001_s3 + $0x8] sm:$0xff] %v612_v21 }
 0x47b   :  { %621 = vsyncpa [#allocation3], 1 }

</bundles_post_ra>
